<compile_context>
chip_gen: v7x
topology: tpu7x:2x2x1
jax: 0.10.0
libtpu: 0.0.40
codegen_flags: <defaults>
</compile_context>

<pallas_src>
import functools

import jax
import jax.numpy as jnp
from jax import lax
from jax.experimental import pallas as pl
from jax.experimental.pallas import tpu as pltpu


def _spatial_attention_kernel(col_ref, x_ref, w_ref, out_ref,
                              sum_ref, max_ref, pad_avg_ref, pad_max_ref, *,
                              C, H, W, kh, kw, padding):
    # Grid = (batch tiles, channel chunks); the channel axis is the reduction.
    # col_ref     : [1, H*W] int32   (t % W), tiny resident VMEM input
    # x_ref       : [tb, tc, H*W]    native-dtype input block
    # w_ref       : [2*kh*kw] f32    conv weights in SMEM (order: chan, ky, kx)
    # out_ref     : [tb, H*W]        sigmoid attention map (x.dtype)
    # sum/max_ref : [tb, H*W] f32    running channel sum / max accumulators
    # pad_*_ref   : [tb, H*W + 2*M]  zero-margined flat pooled maps (M = p*W+p)
    k = pl.program_id(1)
    nk = pl.num_programs(1)
    HW = H * W
    M = padding * W + padding

    @pl.when(k == 0)
    def _init():
        sum_ref[...] = jnp.zeros_like(sum_ref)
        max_ref[...] = jnp.full(max_ref.shape, -jnp.inf, dtype=max_ref.dtype)

    # Fused single-pass sum + max over this channel chunk, 8 channels at a time
    # to bound vreg live ranges.  Everything is lane-dense (last dim = H*W).
    tc = x_ref.shape[1]
    s = sum_ref[...]
    m = max_ref[...]
    for c0 in range(0, tc, 8):
        c1 = min(c0 + 8, tc)
        xc = x_ref[:, c0:c1, :].astype(jnp.float32)         # (tb, <=8, HW)
        s = s + jnp.sum(xc, axis=1)
        m = jnp.maximum(m, jnp.max(xc, axis=1))
    sum_ref[...] = s
    max_ref[...] = m

    @pl.when(k == nk - 1)
    def _finalize():
        avg = sum_ref[...] * (1.0 / C)                       # (tb, HW) f32
        mx = max_ref[...]

        # Zero-margined flat copies of the pooled maps: a statically shifted
        # HW-window read implements every conv tap.  The margins supply the
        # zero padding for row under/overflow; column wrap is masked below.
        pad_avg_ref[...] = jnp.zeros_like(pad_avg_ref)
        pad_max_ref[...] = jnp.zeros_like(pad_max_ref)
        pad_avg_ref[:, M:M + HW] = avg
        pad_max_ref[:, M:M + HW] = mx

        col = col_ref[...]                                   # (1, HW) == t % W
        tb = out_ref.shape[0]
        acc = jnp.zeros((tb, HW), jnp.float32)
        for c, pref in enumerate((pad_avg_ref, pad_max_ref)):   # 0 = avg, 1 = max
            for ky in range(kh):
                dy = ky - padding
                for kx in range(kw):
                    dx = kx - padding
                    w = w_ref[c * kh * kw + ky * kw + kx]       # SMEM scalar
                    off = M + dy * W + dx
                    v = pref[:, off:off + HW]                   # (tb, HW), static slice
                    if dx > 0:
                        v = jnp.where(col < W - dx, v, 0.0)     # no wrap across rows
                    elif dx < 0:
                        v = jnp.where(col >= -dx, v, 0.0)
                    acc = acc + w * v

        out_ref[...] = (1.0 / (1.0 + jnp.exp(-acc))).astype(out_ref.dtype)


def _vmem_limit_bytes():
    try:
        phys = int(pltpu.get_tpu_info().vmem_capacity_bytes)
    except Exception:
        phys = 64 << 20                        # assume smallest (v7x) if query fails
    return min(phys * 3 // 4, 96 << 20)        # v7x ~48 MiB, v5e/v6e ~96 MiB


def _pick_tile(n, cap, sublane_aligned=True):
    """Largest exact divisor of n that is <= cap and a legal TPU block dim
    (multiple of 8, or the full extent, when it sits on the sublane axis)."""
    cap = max(1, min(n, cap))
    best = None
    for d in range(1, n + 1):
        if n % d:
            continue
        if sublane_aligned and d != n and d % 8:
            continue
        if d <= cap:
            best = d
    return best if best is not None else n     # full extent is always legal


def spatial_attention(x, conv_weight, *, padding=1):
    """x: [B, C, H, W]; conv_weight: [1, 2, kh, kw] (nn.Conv2d(2, 1, k, bias=False))."""
    B, C, H, W = x.shape
    out_ch, in_ch, kh, kw = conv_weight.shape
    assert out_ch == 1 and in_ch == 2, "SpatialAttention conv must map 2 -> 1 channels"
    assert kh == kw and kh == 2 * padding + 1, \
        "kernel implements 'same' convs only (kernel_size == 2*padding + 1)"
    # TODO(synk): non-'same' kernel_size/padding combos (different output spatial
    # size) are not handled here.

    HW = H * W
    M = padding * W + padding

    # Layout plumbing only: free trailing-dim reshape; NO pad, NO dtype cast.
    x3 = x.reshape(B, C, HW)
    w_flat = conv_weight.astype(jnp.float32).reshape(-1)             # [2*kh*kw]
    col_ids = (jnp.arange(HW, dtype=jnp.int32) % W).reshape(1, HW)   # t % W

    # Per-generation VMEM budgeting (double-buffered x block dominates).
    vmem_limit = _vmem_limit_bytes()
    block_budget = vmem_limit * 3 // 5
    x_item = jnp.dtype(x.dtype).itemsize
    prod_cap = max(1, block_budget // (2 * HW * x_item))     # cap on tb * tc
    tc = _pick_tile(C, prod_cap, sublane_aligned=True)               # x-block sublane dim
    tb = _pick_tile(B, max(1, prod_cap // tc), sublane_aligned=True)  # out-block sublane dim
    # Prefer >=2 grid steps (cheaply) so the DMA pipeline actually overlaps.
    if (B // tb) * (C // tc) < 2:
        tc2 = _pick_tile(C, max(1, tc // 2), sublane_aligned=True)
        if tc2 < tc:
            tc = tc2
    grid = (B // tb, C // tc)

    kernel = functools.partial(_spatial_attention_kernel,
                               C=C, H=H, W=W, kh=kh, kw=kw, padding=padding)

    out2d = pl.pallas_call(
        kernel,
        out_shape=jax.ShapeDtypeStruct((B, HW), x.dtype),
        grid_spec=pltpu.PrefetchScalarGridSpec(
            num_scalar_prefetch=0,
            grid=grid,
            in_specs=[
                # Column index (t % W): tiny, resident across the whole grid.
                pl.BlockSpec((1, HW), lambda b, k: (0, 0)),
                # Input block: batch tile x channel chunk, lane-dense spatial.
                pl.BlockSpec((tb, tc, HW), lambda b, k: (b, k, 0)),
                # 2*kh*kw conv weights as SMEM scalars.
                pl.BlockSpec(memory_space=pltpu.MemorySpace.SMEM),
            ],
            out_specs=pl.BlockSpec((tb, HW), lambda b, k: (b, 0)),
            scratch_shapes=[
                pltpu.VMEM((tb, HW), jnp.float32),             # running channel sum
                pltpu.VMEM((tb, HW), jnp.float32),             # running channel max
                pltpu.VMEM((tb, HW + 2 * M), jnp.float32),     # zero-margined avg map
                pltpu.VMEM((tb, HW + 2 * M), jnp.float32),     # zero-margined max map
            ],
        ),
        compiler_params=pltpu.CompilerParams(
            dimension_semantics=("parallel", "arbitrary"),
            vmem_limit_bytes=vmem_limit,
        ),
        cost_estimate=pl.CostEstimate(
            flops=2 * B * C * HW + 4 * B * HW * in_ch * kh * kw,
            transcendentals=B * HW,
            bytes_accessed=x3.size * x_item + B * HW * x_item
                           + col_ids.size * 4 + w_flat.size * 4,
        ),
    )(col_ids, x3, w_flat)

    return out2d.reshape(B, 1, H, W)


if __name__ == "__main__":
    # Small shapes consistent with the module: NCHW input, Conv2d(2, 1, 3, padding=1).
    B, C, H, W = 2, 4, 16, 16
    kernel_size, padding = 3, 1

    key = jax.random.PRNGKey(0)
    k_x, k_w = jax.random.split(key)

    x = jax.random.normal(k_x, (B, C, H, W), dtype=jnp.float32)

    fan_in = 2 * kernel_size * kernel_size
    bound = 1.0 / (fan_in ** 0.5)
    conv_w = jax.random.uniform(k_w, (1, 2, kernel_size, kernel_size),
                                dtype=jnp.float32, minval=-bound, maxval=bound)

    out = spatial_attention(x, conv_w, padding=padding)
    out = jax.block_until_ready(out)

    # Pure-JAX reference (same forward semantics as the PyTorch module).
    avg_ref = jnp.mean(x, axis=1, keepdims=True)
    max_ref = jnp.max(x, axis=1, keepdims=True)
    cat_ref = jnp.concatenate([avg_ref, max_ref], axis=1)
    conv_ref = lax.conv_general_dilated(
        cat_ref, conv_w, window_strides=(1, 1),
        padding=((padding, padding), (padding, padding)),
        dimension_numbers=("NCHW", "OIHW", "NCHW"),
        precision=lax.Precision.HIGHEST)
    ref = jax.nn.sigmoid(conv_ref)

    assert out.shape == (B, 1, H, W)
    assert jnp.allclose(out, ref, atol=1e-5, rtol=1e-5)
    print("KERNEL_OK")
</pallas_src>

<mosaic_0001>
module attributes {stable_mosaic.version = 11 : i64} {
  func.func @_spatial_attention_kernel(%arg0: i32, %arg1: i32, %arg2: memref<1x256xi32, #tpu.memory_space<vmem>>, %arg3: memref<2x4x256xf32, #tpu.memory_space<vmem>>, %arg4: memref<18xf32, #tpu.memory_space<smem>>, %arg5: memref<2x256xf32, #tpu.memory_space<vmem>>, %arg6: memref<2x256xf32, #tpu.memory_space<vmem>>, %arg7: memref<2x256xf32, #tpu.memory_space<vmem>>, %arg8: memref<2x290xf32, #tpu.memory_space<vmem>>, %arg9: memref<2x290xf32, #tpu.memory_space<vmem>>) attributes {dimension_semantics = [#tpu.dimension_semantics<parallel>, #tpu.dimension_semantics<arbitrary>], iteration_bounds = array<i64: 1, 1>, scalar_prefetch = 0 : i64, scratch_operands = 4 : i64, tpu.core_type = #tpu.core_type<tc>, window_params = [{pipeline_mode = #tpu.pipeline_mode<synchronous>, transform_indices = @transform_0, window_bounds = array<i64: 1, 256>}, {transform_indices = @transform_1, window_bounds = array<i64: 2, 4, 256>}, {transform_indices = @transform_2, window_bounds = array<i64: 18>}, {transform_indices = @transform_3, window_bounds = array<i64: 2, 256>}]} {
    %c0_i32 = arith.constant 0 : i32
    %0 = arith.cmpi eq, %arg1, %c0_i32 : i32
    %1 = arith.extui %0 : i1 to i32
    %c0_i32_0 = arith.constant 0 : i32
    %2 = arith.cmpi ne, %1, %c0_i32_0 : i32
    scf.if %2 {
      %cst_14 = arith.constant 0.000000e+00 : f32
      %15 = vector.broadcast %cst_14 : f32 to vector<2x256xf32>
      %c0_15 = arith.constant 0 : index
      %c0_16 = arith.constant 0 : index
      %16 = vector.load %arg6[%c0_15, %c0_16] : memref<2x256xf32, #tpu.memory_space<vmem>>, vector<2x256xf32>
      tpu.vector_store %arg6[%c0_15, %c0_16], %15 {strides = array<i32>} : memref<2x256xf32, #tpu.memory_space<vmem>>, vector<2x256xf32>,
      %cst_17 = arith.constant 0xFF800000 : f32
      %17 = vector.broadcast %cst_17 : f32 to vector<2x256xf32>
      %c0_18 = arith.constant 0 : index
      %c0_19 = arith.constant 0 : index
      %18 = vector.load %arg7[%c0_18, %c0_19] : memref<2x256xf32, #tpu.memory_space<vmem>>, vector<2x256xf32>
      tpu.vector_store %arg7[%c0_18, %c0_19], %17 {strides = array<i32>} : memref<2x256xf32, #tpu.memory_space<vmem>>, vector<2x256xf32>,
    } else {
    }
    %c0 = arith.constant 0 : index
    %c0_1 = arith.constant 0 : index
    %3 = vector.load %arg6[%c0, %c0_1] : memref<2x256xf32, #tpu.memory_space<vmem>>, vector<2x256xf32>
    %c0_2 = arith.constant 0 : index
    %c0_3 = arith.constant 0 : index
    %4 = vector.load %arg7[%c0_2, %c0_3] : memref<2x256xf32, #tpu.memory_space<vmem>>, vector<2x256xf32>
    %c0_4 = arith.constant 0 : index
    %c0_5 = arith.constant 0 : index
    %c0_6 = arith.constant 0 : index
    %5 = vector.load %arg3[%c0_4, %c0_5, %c0_6] : memref<2x4x256xf32, #tpu.memory_space<vmem>>, vector<2x4x256xf32>
    %cst = arith.constant dense<0.000000e+00> : vector<2x256xf32>
    %6 = vector.multi_reduction <add>, %5, %cst [1] : vector<2x4x256xf32> to vector<2x256xf32>
    %7 = arith.addf %3, %6 : vector<2x256xf32>
    %cst_7 = arith.constant dense<0xFF800000> : vector<2x256xf32>
    %8 = vector.multi_reduction <maximumf>, %5, %cst_7 [1] : vector<2x4x256xf32> to vector<2x256xf32>
    %9 = arith.maximumf %4, %8 : vector<2x256xf32>
    %c0_8 = arith.constant 0 : index
    %c0_9 = arith.constant 0 : index
    %10 = vector.load %arg6[%c0_8, %c0_9] : memref<2x256xf32, #tpu.memory_space<vmem>>, vector<2x256xf32>
    tpu.vector_store %arg6[%c0_8, %c0_9], %7 {strides = array<i32>} : memref<2x256xf32, #tpu.memory_space<vmem>>, vector<2x256xf32>,
    %c0_10 = arith.constant 0 : index
    %c0_11 = arith.constant 0 : index
    %11 = vector.load %arg7[%c0_10, %c0_11] : memref<2x256xf32, #tpu.memory_space<vmem>>, vector<2x256xf32>
    tpu.vector_store %arg7[%c0_10, %c0_11], %9 {strides = array<i32>} : memref<2x256xf32, #tpu.memory_space<vmem>>, vector<2x256xf32>,
    %c0_i32_12 = arith.constant 0 : i32
    %12 = arith.cmpi eq, %arg1, %c0_i32_12 : i32
    %13 = arith.extui %12 : i1 to i32
    %c0_i32_13 = arith.constant 0 : i32
    %14 = arith.cmpi ne, %13, %c0_i32_13 : i32
    scf.if %14 {
      %c0_14 = arith.constant 0 : index
      %c0_15 = arith.constant 0 : index
      %15 = vector.load %arg6[%c0_14, %c0_15] : memref<2x256xf32, #tpu.memory_space<vmem>>, vector<2x256xf32>
      %cst_16 = arith.constant 2.500000e-01 : f32
      %16 = vector.broadcast %cst_16 : f32 to vector<2x256xf32>
      %17 = arith.mulf %15, %16 : vector<2x256xf32>
      %c0_17 = arith.constant 0 : index
      %c0_18 = arith.constant 0 : index
      %18 = vector.load %arg7[%c0_17, %c0_18] : memref<2x256xf32, #tpu.memory_space<vmem>>, vector<2x256xf32>
      %cst_19 = arith.constant 0.000000e+00 : f32
      %19 = vector.broadcast %cst_19 : f32 to vector<2x290xf32>
      %c0_20 = arith.constant 0 : index
      %c0_21 = arith.constant 0 : index
      %20 = vector.load %arg8[%c0_20, %c0_21] : memref<2x290xf32, #tpu.memory_space<vmem>>, vector<2x290xf32>
      tpu.vector_store %arg8[%c0_20, %c0_21], %19 {strides = array<i32>} : memref<2x290xf32, #tpu.memory_space<vmem>>, vector<2x290xf32>,
      %cst_22 = arith.constant 0.000000e+00 : f32
      %21 = vector.broadcast %cst_22 : f32 to vector<2x290xf32>
      %c0_23 = arith.constant 0 : index
      %c0_24 = arith.constant 0 : index
      %22 = vector.load %arg9[%c0_23, %c0_24] : memref<2x290xf32, #tpu.memory_space<vmem>>, vector<2x290xf32>
      tpu.vector_store %arg9[%c0_23, %c0_24], %21 {strides = array<i32>} : memref<2x290xf32, #tpu.memory_space<vmem>>, vector<2x290xf32>,
      %c0_25 = arith.constant 0 : index
      %c17 = arith.constant 17 : index
      %23 = vector.load %arg8[%c0_25, %c17] : memref<2x290xf32, #tpu.memory_space<vmem>>, vector<2x256xf32>
      tpu.vector_store %arg8[%c0_25, %c17], %17 {strides = array<i32>} : memref<2x290xf32, #tpu.memory_space<vmem>>, vector<2x256xf32>,
      %c0_26 = arith.constant 0 : index
      %c17_27 = arith.constant 17 : index
      %24 = vector.load %arg9[%c0_26, %c17_27] : memref<2x290xf32, #tpu.memory_space<vmem>>, vector<2x256xf32>
      tpu.vector_store %arg9[%c0_26, %c17_27], %18 {strides = array<i32>} : memref<2x290xf32, #tpu.memory_space<vmem>>, vector<2x256xf32>,
      %c0_28 = arith.constant 0 : index
      %c0_29 = arith.constant 0 : index
      %25 = vector.load %arg2[%c0_28, %c0_29] : memref<1x256xi32, #tpu.memory_space<vmem>>, vector<1x256xi32>
      %cst_30 = arith.constant 0.000000e+00 : f32
      %26 = vector.broadcast %cst_30 : f32 to vector<2x256xf32>
      %c0_31 = arith.constant 0 : index
      %27 = memref.load %arg4[%c0_31] : memref<18xf32, #tpu.memory_space<smem>>
      %c0_32 = arith.constant 0 : index
      %c0_33 = arith.constant 0 : index
      %28 = vector.load %arg8[%c0_32, %c0_33] : memref<2x290xf32, #tpu.memory_space<vmem>>, vector<2x256xf32>
      %c1_i32 = arith.constant 1 : i32
      %29 = vector.broadcast %c1_i32 : i32 to vector<1x256xi32>
      %30 = arith.cmpi sge, %25, %29 : vector<1x256xi32>
      %cst_34 = arith.constant 0.000000e+00 : f32
      %31 = vector.shape_cast %30 : vector<1x256xi1> to vector<1x256xi1>
      %32 = vector.broadcast %31 : vector<1x256xi1> to vector<2x256xi1>
      %33 = vector.broadcast %cst_34 : f32 to vector<2x256xf32>
      %34 = arith.select %32, %28, %33 : vector<2x256xi1>, vector<2x256xf32>
      %35 = vector.broadcast %27 : f32 to vector<2x256xf32>
      %36 = arith.mulf %35, %34 : vector<2x256xf32>
      %37 = arith.addf %26, %36 : vector<2x256xf32>
      %c1 = arith.constant 1 : index
      %38 = memref.load %arg4[%c1] : memref<18xf32, #tpu.memory_space<smem>>
      %c0_35 = arith.constant 0 : index
      %c1_36 = arith.constant 1 : index
      %39 = vector.load %arg8[%c0_35, %c1_36] : memref<2x290xf32, #tpu.memory_space<vmem>>, vector<2x256xf32>
      %40 = vector.broadcast %38 : f32 to vector<2x256xf32>
      %41 = arith.mulf %40, %39 : vector<2x256xf32>
      %42 = arith.addf %37, %41 : vector<2x256xf32>
      %c2 = arith.constant 2 : index
      %43 = memref.load %arg4[%c2] : memref<18xf32, #tpu.memory_space<smem>>
      %c0_37 = arith.constant 0 : index
      %c2_38 = arith.constant 2 : index
      %44 = vector.load %arg8[%c0_37, %c2_38] : memref<2x290xf32, #tpu.memory_space<vmem>>, vector<2x256xf32>
      %c15_i32 = arith.constant 15 : i32
      %45 = vector.broadcast %c15_i32 : i32 to vector<1x256xi32>
      %46 = arith.cmpi slt, %25, %45 : vector<1x256xi32>
      %cst_39 = arith.constant 0.000000e+00 : f32
      %47 = vector.shape_cast %46 : vector<1x256xi1> to vector<1x256xi1>
      %48 = vector.broadcast %47 : vector<1x256xi1> to vector<2x256xi1>
      %49 = vector.broadcast %cst_39 : f32 to vector<2x256xf32>
      %50 = arith.select %48, %44, %49 : vector<2x256xi1>, vector<2x256xf32>
      %51 = vector.broadcast %43 : f32 to vector<2x256xf32>
      %52 = arith.mulf %51, %50 : vector<2x256xf32>
      %53 = arith.addf %42, %52 : vector<2x256xf32>
      %c3 = arith.constant 3 : index
      %54 = memref.load %arg4[%c3] : memref<18xf32, #tpu.memory_space<smem>>
      %c0_40 = arith.constant 0 : index
      %c16 = arith.constant 16 : index
      %55 = vector.load %arg8[%c0_40, %c16] : memref<2x290xf32, #tpu.memory_space<vmem>>, vector<2x256xf32>
      %c1_i32_41 = arith.constant 1 : i32
      %56 = vector.broadcast %c1_i32_41 : i32 to vector<1x256xi32>
      %57 = arith.cmpi sge, %25, %56 : vector<1x256xi32>
      %cst_42 = arith.constant 0.000000e+00 : f32
      %58 = vector.shape_cast %57 : vector<1x256xi1> to vector<1x256xi1>
      %59 = vector.broadcast %58 : vector<1x256xi1> to vector<2x256xi1>
      %60 = vector.broadcast %cst_42 : f32 to vector<2x256xf32>
      %61 = arith.select %59, %55, %60 : vector<2x256xi1>, vector<2x256xf32>
      %62 = vector.broadcast %54 : f32 to vector<2x256xf32>
      %63 = arith.mulf %62, %61 : vector<2x256xf32>
      %64 = arith.addf %53, %63 : vector<2x256xf32>
      %c4 = arith.constant 4 : index
      %65 = memref.load %arg4[%c4] : memref<18xf32, #tpu.memory_space<smem>>
      %c0_43 = arith.constant 0 : index
      %c17_44 = arith.constant 17 : index
      %66 = vector.load %arg8[%c0_43, %c17_44] : memref<2x290xf32, #tpu.memory_space<vmem>>, vector<2x256xf32>
      %67 = vector.broadcast %65 : f32 to vector<2x256xf32>
      %68 = arith.mulf %67, %66 : vector<2x256xf32>
      %69 = arith.addf %64, %68 : vector<2x256xf32>
      %c5 = arith.constant 5 : index
      %70 = memref.load %arg4[%c5] : memref<18xf32, #tpu.memory_space<smem>>
      %c0_45 = arith.constant 0 : index
      %c18 = arith.constant 18 : index
      %71 = vector.load %arg8[%c0_45, %c18] : memref<2x290xf32, #tpu.memory_space<vmem>>, vector<2x256xf32>
      %c15_i32_46 = arith.constant 15 : i32
      %72 = vector.broadcast %c15_i32_46 : i32 to vector<1x256xi32>
      %73 = arith.cmpi slt, %25, %72 : vector<1x256xi32>
      %cst_47 = arith.constant 0.000000e+00 : f32
      %74 = vector.shape_cast %73 : vector<1x256xi1> to vector<1x256xi1>
      %75 = vector.broadcast %74 : vector<1x256xi1> to vector<2x256xi1>
      %76 = vector.broadcast %cst_47 : f32 to vector<2x256xf32>
      %77 = arith.select %75, %71, %76 : vector<2x256xi1>, vector<2x256xf32>
      %78 = vector.broadcast %70 : f32 to vector<2x256xf32>
      %79 = arith.mulf %78, %77 : vector<2x256xf32>
      %80 = arith.addf %69, %79 : vector<2x256xf32>
      %c6 = arith.constant 6 : index
      %81 = memref.load %arg4[%c6] : memref<18xf32, #tpu.memory_space<smem>>
      %c0_48 = arith.constant 0 : index
      %c32 = arith.constant 32 : index
      %82 = vector.load %arg8[%c0_48, %c32] : memref<2x290xf32, #tpu.memory_space<vmem>>, vector<2x256xf32>
      %c1_i32_49 = arith.constant 1 : i32
      %83 = vector.broadcast %c1_i32_49 : i32 to vector<1x256xi32>
      %84 = arith.cmpi sge, %25, %83 : vector<1x256xi32>
      %cst_50 = arith.constant 0.000000e+00 : f32
      %85 = vector.shape_cast %84 : vector<1x256xi1> to vector<1x256xi1>
      %86 = vector.broadcast %85 : vector<1x256xi1> to vector<2x256xi1>
      %87 = vector.broadcast %cst_50 : f32 to vector<2x256xf32>
      %88 = arith.select %86, %82, %87 : vector<2x256xi1>, vector<2x256xf32>
      %89 = vector.broadcast %81 : f32 to vector<2x256xf32>
      %90 = arith.mulf %89, %88 : vector<2x256xf32>
      %91 = arith.addf %80, %90 : vector<2x256xf32>
      %c7 = arith.constant 7 : index
      %92 = memref.load %arg4[%c7] : memref<18xf32, #tpu.memory_space<smem>>
      %c0_51 = arith.constant 0 : index
      %c33 = arith.constant 33 : index
      %93 = vector.load %arg8[%c0_51, %c33] : memref<2x290xf32, #tpu.memory_space<vmem>>, vector<2x256xf32>
      %94 = vector.broadcast %92 : f32 to vector<2x256xf32>
      %95 = arith.mulf %94, %93 : vector<2x256xf32>
      %96 = arith.addf %91, %95 : vector<2x256xf32>
      %c8 = arith.constant 8 : index
      %97 = memref.load %arg4[%c8] : memref<18xf32, #tpu.memory_space<smem>>
      %c0_52 = arith.constant 0 : index
      %c34 = arith.constant 34 : index
      %98 = vector.load %arg8[%c0_52, %c34] : memref<2x290xf32, #tpu.memory_space<vmem>>, vector<2x256xf32>
      %c15_i32_53 = arith.constant 15 : i32
      %99 = vector.broadcast %c15_i32_53 : i32 to vector<1x256xi32>
      %100 = arith.cmpi slt, %25, %99 : vector<1x256xi32>
      %cst_54 = arith.constant 0.000000e+00 : f32
      %101 = vector.shape_cast %100 : vector<1x256xi1> to vector<1x256xi1>
      %102 = vector.broadcast %101 : vector<1x256xi1> to vector<2x256xi1>
      %103 = vector.broadcast %cst_54 : f32 to vector<2x256xf32>
      %104 = arith.select %102, %98, %103 : vector<2x256xi1>, vector<2x256xf32>
      %105 = vector.broadcast %97 : f32 to vector<2x256xf32>
      %106 = arith.mulf %105, %104 : vector<2x256xf32>
      %107 = arith.addf %96, %106 : vector<2x256xf32>
      %c9 = arith.constant 9 : index
      %108 = memref.load %arg4[%c9] : memref<18xf32, #tpu.memory_space<smem>>
      %c0_55 = arith.constant 0 : index
      %c0_56 = arith.constant 0 : index
      %109 = vector.load %arg9[%c0_55, %c0_56] : memref<2x290xf32, #tpu.memory_space<vmem>>, vector<2x256xf32>
      %c1_i32_57 = arith.constant 1 : i32
      %110 = vector.broadcast %c1_i32_57 : i32 to vector<1x256xi32>
      %111 = arith.cmpi sge, %25, %110 : vector<1x256xi32>
      %cst_58 = arith.constant 0.000000e+00 : f32
      %112 = vector.shape_cast %111 : vector<1x256xi1> to vector<1x256xi1>
      %113 = vector.broadcast %112 : vector<1x256xi1> to vector<2x256xi1>
      %114 = vector.broadcast %cst_58 : f32 to vector<2x256xf32>
      %115 = arith.select %113, %109, %114 : vector<2x256xi1>, vector<2x256xf32>
      %116 = vector.broadcast %108 : f32 to vector<2x256xf32>
      %117 = arith.mulf %116, %115 : vector<2x256xf32>
      %118 = arith.addf %107, %117 : vector<2x256xf32>
      %c10 = arith.constant 10 : index
      %119 = memref.load %arg4[%c10] : memref<18xf32, #tpu.memory_space<smem>>
      %c0_59 = arith.constant 0 : index
      %c1_60 = arith.constant 1 : index
      %120 = vector.load %arg9[%c0_59, %c1_60] : memref<2x290xf32, #tpu.memory_space<vmem>>, vector<2x256xf32>
      %121 = vector.broadcast %119 : f32 to vector<2x256xf32>
      %122 = arith.mulf %121, %120 : vector<2x256xf32>
      %123 = arith.addf %118, %122 : vector<2x256xf32>
      %c11 = arith.constant 11 : index
      %124 = memref.load %arg4[%c11] : memref<18xf32, #tpu.memory_space<smem>>
      %c0_61 = arith.constant 0 : index
      %c2_62 = arith.constant 2 : index
      %125 = vector.load %arg9[%c0_61, %c2_62] : memref<2x290xf32, #tpu.memory_space<vmem>>, vector<2x256xf32>
      %c15_i32_63 = arith.constant 15 : i32
      %126 = vector.broadcast %c15_i32_63 : i32 to vector<1x256xi32>
      %127 = arith.cmpi slt, %25, %126 : vector<1x256xi32>
      %cst_64 = arith.constant 0.000000e+00 : f32
      %128 = vector.shape_cast %127 : vector<1x256xi1> to vector<1x256xi1>
      %129 = vector.broadcast %128 : vector<1x256xi1> to vector<2x256xi1>
      %130 = vector.broadcast %cst_64 : f32 to vector<2x256xf32>
      %131 = arith.select %129, %125, %130 : vector<2x256xi1>, vector<2x256xf32>
      %132 = vector.broadcast %124 : f32 to vector<2x256xf32>
      %133 = arith.mulf %132, %131 : vector<2x256xf32>
      %134 = arith.addf %123, %133 : vector<2x256xf32>
      %c12 = arith.constant 12 : index
      %135 = memref.load %arg4[%c12] : memref<18xf32, #tpu.memory_space<smem>>
      %c0_65 = arith.constant 0 : index
      %c16_66 = arith.constant 16 : index
      %136 = vector.load %arg9[%c0_65, %c16_66] : memref<2x290xf32, #tpu.memory_space<vmem>>, vector<2x256xf32>
      %c1_i32_67 = arith.constant 1 : i32
      %137 = vector.broadcast %c1_i32_67 : i32 to vector<1x256xi32>
      %138 = arith.cmpi sge, %25, %137 : vector<1x256xi32>
      %cst_68 = arith.constant 0.000000e+00 : f32
      %139 = vector.shape_cast %138 : vector<1x256xi1> to vector<1x256xi1>
      %140 = vector.broadcast %139 : vector<1x256xi1> to vector<2x256xi1>
      %141 = vector.broadcast %cst_68 : f32 to vector<2x256xf32>
      %142 = arith.select %140, %136, %141 : vector<2x256xi1>, vector<2x256xf32>
      %143 = vector.broadcast %135 : f32 to vector<2x256xf32>
      %144 = arith.mulf %143, %142 : vector<2x256xf32>
      %145 = arith.addf %134, %144 : vector<2x256xf32>
      %c13 = arith.constant 13 : index
      %146 = memref.load %arg4[%c13] : memref<18xf32, #tpu.memory_space<smem>>
      %c0_69 = arith.constant 0 : index
      %c17_70 = arith.constant 17 : index
      %147 = vector.load %arg9[%c0_69, %c17_70] : memref<2x290xf32, #tpu.memory_space<vmem>>, vector<2x256xf32>
      %148 = vector.broadcast %146 : f32 to vector<2x256xf32>
      %149 = arith.mulf %148, %147 : vector<2x256xf32>
      %150 = arith.addf %145, %149 : vector<2x256xf32>
      %c14 = arith.constant 14 : index
      %151 = memref.load %arg4[%c14] : memref<18xf32, #tpu.memory_space<smem>>
      %c0_71 = arith.constant 0 : index
      %c18_72 = arith.constant 18 : index
      %152 = vector.load %arg9[%c0_71, %c18_72] : memref<2x290xf32, #tpu.memory_space<vmem>>, vector<2x256xf32>
      %c15_i32_73 = arith.constant 15 : i32
      %153 = vector.broadcast %c15_i32_73 : i32 to vector<1x256xi32>
      %154 = arith.cmpi slt, %25, %153 : vector<1x256xi32>
      %cst_74 = arith.constant 0.000000e+00 : f32
      %155 = vector.shape_cast %154 : vector<1x256xi1> to vector<1x256xi1>
      %156 = vector.broadcast %155 : vector<1x256xi1> to vector<2x256xi1>
      %157 = vector.broadcast %cst_74 : f32 to vector<2x256xf32>
      %158 = arith.select %156, %152, %157 : vector<2x256xi1>, vector<2x256xf32>
      %159 = vector.broadcast %151 : f32 to vector<2x256xf32>
      %160 = arith.mulf %159, %158 : vector<2x256xf32>
      %161 = arith.addf %150, %160 : vector<2x256xf32>
      %c15 = arith.constant 15 : index
      %162 = memref.load %arg4[%c15] : memref<18xf32, #tpu.memory_space<smem>>
      %c0_75 = arith.constant 0 : index
      %c32_76 = arith.constant 32 : index
      %163 = vector.load %arg9[%c0_75, %c32_76] : memref<2x290xf32, #tpu.memory_space<vmem>>, vector<2x256xf32>
      %c1_i32_77 = arith.constant 1 : i32
      %164 = vector.broadcast %c1_i32_77 : i32 to vector<1x256xi32>
      %165 = arith.cmpi sge, %25, %164 : vector<1x256xi32>
      %cst_78 = arith.constant 0.000000e+00 : f32
      %166 = vector.shape_cast %165 : vector<1x256xi1> to vector<1x256xi1>
      %167 = vector.broadcast %166 : vector<1x256xi1> to vector<2x256xi1>
      %168 = vector.broadcast %cst_78 : f32 to vector<2x256xf32>
      %169 = arith.select %167, %163, %168 : vector<2x256xi1>, vector<2x256xf32>
      %170 = vector.broadcast %162 : f32 to vector<2x256xf32>
      %171 = arith.mulf %170, %169 : vector<2x256xf32>
      %172 = arith.addf %161, %171 : vector<2x256xf32>
      %c16_79 = arith.constant 16 : index
      %173 = memref.load %arg4[%c16_79] : memref<18xf32, #tpu.memory_space<smem>>
      %c0_80 = arith.constant 0 : index
      %c33_81 = arith.constant 33 : index
      %174 = vector.load %arg9[%c0_80, %c33_81] : memref<2x290xf32, #tpu.memory_space<vmem>>, vector<2x256xf32>
      %175 = vector.broadcast %173 : f32 to vector<2x256xf32>
      %176 = arith.mulf %175, %174 : vector<2x256xf32>
      %177 = arith.addf %172, %176 : vector<2x256xf32>
      %c17_82 = arith.constant 17 : index
      %178 = memref.load %arg4[%c17_82] : memref<18xf32, #tpu.memory_space<smem>>
      %c0_83 = arith.constant 0 : index
      %c34_84 = arith.constant 34 : index
      %179 = vector.load %arg9[%c0_83, %c34_84] : memref<2x290xf32, #tpu.memory_space<vmem>>, vector<2x256xf32>
      %c15_i32_85 = arith.constant 15 : i32
      %180 = vector.broadcast %c15_i32_85 : i32 to vector<1x256xi32>
      %181 = arith.cmpi slt, %25, %180 : vector<1x256xi32>
      %cst_86 = arith.constant 0.000000e+00 : f32
      %182 = vector.shape_cast %181 : vector<1x256xi1> to vector<1x256xi1>
      %183 = vector.broadcast %182 : vector<1x256xi1> to vector<2x256xi1>
      %184 = vector.broadcast %cst_86 : f32 to vector<2x256xf32>
      %185 = arith.select %183, %179, %184 : vector<2x256xi1>, vector<2x256xf32>
      %186 = vector.broadcast %178 : f32 to vector<2x256xf32>
      %187 = arith.mulf %186, %185 : vector<2x256xf32>
      %188 = arith.addf %177, %187 : vector<2x256xf32>
      %cst_87 = arith.constant 0.000000e+00 : f32
      %189 = vector.broadcast %cst_87 : f32 to vector<2x256xf32>
      %190 = arith.subf %189, %188 : vector<2x256xf32>
      %191 = math.exp %190 : vector<2x256xf32>
      %cst_88 = arith.constant 1.000000e+00 : f32
      %192 = vector.broadcast %cst_88 : f32 to vector<2x256xf32>
      %193 = arith.addf %192, %191 : vector<2x256xf32>
      %cst_89 = arith.constant 1.000000e+00 : f32
      %194 = vector.broadcast %cst_89 : f32 to vector<2x256xf32>
      %195 = arith.divf %194, %193 : vector<2x256xf32>
      %c0_90 = arith.constant 0 : index
      %c0_91 = arith.constant 0 : index
      %196 = vector.load %arg5[%c0_90, %c0_91] : memref<2x256xf32, #tpu.memory_space<vmem>>, vector<2x256xf32>
      tpu.vector_store %arg5[%c0_90, %c0_91], %195 {strides = array<i32>} : memref<2x256xf32, #tpu.memory_space<vmem>>, vector<2x256xf32>,
    } else {
    }
    return
  }
  func.func @transform_0(%arg0: i32, %arg1: i32) -> (i32, i32) {
    %c0_i32 = arith.constant 0 : i32
    %c0_i32_0 = arith.constant 0 : i32
    %c0_i32_1 = arith.constant 0 : i32
    return %c0_i32, %c0_i32_0 : i32, i32
  }
  func.func @transform_1(%arg0: i32, %arg1: i32) -> (i32, i32, i32) {
    %c0_i32 = arith.constant 0 : i32
    %c0_i32_0 = arith.constant 0 : i32
    return %arg0, %arg1, %c0_i32 : i32, i32, i32
  }
  func.func @transform_2(%arg0: i32, %arg1: i32) -> i32 {
    %c0_i32 = arith.constant 0 : i32
    %c0_i32_0 = arith.constant 0 : i32
    return %c0_i32 : i32
  }
  func.func @transform_3(%arg0: i32, %arg1: i32) -> (i32, i32) {
    %c0_i32 = arith.constant 0 : i32
    %c0_i32_0 = arith.constant 0 : i32
    return %arg0, %c0_i32 : i32, i32
  }
}

</mosaic_0001>

<bundles_post_ra>
// kernel: tpu_custom_call.1
= control target key start
LH: loop header
LB: loop body
LE: loop exit
PB: predicated region body
PF: predicated region fallthrough
CT: control target
= control target key end

     0   :  { %8 = vsyncpa [#allocation7], 0  ;;  %s1458_s0 = inlined_call_operand.hbm [shape: s32[1,256], index: 0, kind: input, shape index: {}]   ;;  %s1459_s1 = inlined_call_operand.hbm [shape: f32[2,4,256], index: 1, kind: input, shape index: {}]   ;;  %s1460_s2 = inlined_call_operand.vmem [shape: f32[18], index: 2, kind: input, shape index: {}]   ;;  %s1461_s3 = inlined_call_operand.hbm [shape: f32[2,256], index: 3, kind: output, shape index: {}]  }
   0x1   :  { %9 = vsyncpa [#allocation11], 0 }
   0x2   :  { %10 = vsyncpa [#allocation9], 0 }
   0x3   :  { %11 = vsyncpa [#allocation8], 0  ;;  %s1042_s12 = smov [#allocation6]   ;;  %s1043_s14 = smov [#allocation10]  }
   0x4   :  { %s18_s13 = sshll.u32 %s1042_s12, 4  ;;  %s27_s15 = sshll.u32 %s1043_s14, 4  ;;  %s19_s13 = int_to_ptr.vmem [resolvable:$true] %s18_s13  ;;  %s1081_s15 = int_to_ptr.vmem [resolvable:$true] %s27_s15 }
   0x5   :  { %s956_s18 = scalar_lea.hbm %s1458_s0, 32 }
   0x6   :  { %p957_p0 = scmp.ne.s32.totalorder %s1458_s0, %s956_s18  ;;  %p960_p1 = scmp.lt.u32.totalorder %s956_s18, %s1458_s0 }
   0x8   :  { %p962_p2 = pnand %p960_p1, %p957_p0 }
   0xa   :  { %965 = shalt.err (!%p962_p2)
}
   0xb   :  { %s966_s23 = scalar_lea.vmem %s19_s13, 32  ;;  %p971_p4 = scmp.lt.s32.totalorder %s19_s13, %s19_s13 }
   0xc   :  { %p967_p3 = scmp.ne.s32.totalorder %s19_s13, %s966_s23  ;;  %p972_p5 = scmp.lt.s32.totalorder %s966_s23, %s966_s23 }
   0xe   :  { %p973_p6 = por %p972_p5, %p971_p4 }
  0x10   :  { %p974_p7 = pnand %p973_p6, %p967_p3 }
  0x12   :  { %977 = shalt.err (!%p974_p7)
}
  0x13   :  { %21 = dma.hbm_to_vmem [thread:$0]  %s1458_s0, 32, %s19_s13, [#allocation7]  }
  0x14   :  { %s978_s28 = scalar_lea.hbm %s1459_s1, 256 }
  0x15   :  { %p979_p8 = scmp.ne.s32.totalorder %s1459_s1, %s978_s28  ;;  %p982_p9 = scmp.lt.u32.totalorder %s978_s28, %s1459_s1 }
  0x17   :  { %p984_p10 = pnand %p982_p9, %p979_p8 }
  0x19   :  { %987 = shalt.err (!%p984_p10)
}
  0x1a   :  { %s988_s6 = scalar_lea.vmem %s1081_s15, 256  ;;  %p993_p12 = scmp.lt.s32.totalorder %s1081_s15, %s1081_s15 }
  0x1b   :  { %p989_p11 = scmp.ne.s32.totalorder %s1081_s15, %s988_s6  ;;  %p994_p13 = scmp.lt.s32.totalorder %s988_s6, %s988_s6 }
  0x1d   :  { %p995_p0 = por %p994_p13, %p993_p12 }
  0x1f   :  { %p996_p1 = pnand %p995_p0, %p989_p11 }
  0x21   :  { %999 = shalt.err (!%p996_p1)
}
  0x22   :  { %s1044_s0 = smov 128   ;;  %s1045_s7 = smov 8  }
  0x23   :  { %33 = dma.hbm_to_vmem [thread:$0]  %s1459_s1, 256, %s1081_s15, [#allocation11], %s1044_s0, %s1044_s0, %s1045_s7  }
  0x24   :  { %s40_s12 = sshll.u32 %s1460_s2, 4  ;;  %s41_s12 = int_to_ptr.vmem [resolvable:$true] %s40_s12 }
  0x25   :  { %s1000_s13 = scalar_lea.vmem %s41_s12, 16  ;;  %p1005_p3 = scmp.lt.s32.totalorder %s41_s12, %s41_s12 }
  0x26   :  { %p1001_p2 = scmp.ne.s32.totalorder %s41_s12, %s1000_s13  ;;  %p1006_p4 = scmp.lt.s32.totalorder %s1000_s13, %s1000_s13 }
  0x28   :  { %p1007_p5 = por %p1006_p4, %p1005_p3 }
  0x2a   :  { %p1008_p6 = pnand %p1007_p5, %p1001_p2 }
  0x2c   :  { %1011 = shalt.err (!%p1008_p6)
}
  0x2d   :  { %s1046_s14 = smov [#allocation12]  }
  0x2e   :  { %43 = dma.vmem_to_smem %s41_s12, 16, %s1046_s14, [#allocation9]  }
  0x2f   :  { %1034 = dma.done.wait [#allocation7], 32  }
  0x30   :  { %1035 = vsyncadd [#allocation7], 4294967264 }
  0x31   :  { %1036 = dma.done.wait [#allocation11], 256  }
  0x32   :  { %1037 = vsyncadd [#allocation11], 4294967040 }
  0x33   :  { %1038 = dma.done.wait [#allocation9], 16  }
  0x34   :  { %1039 = vsyncadd [#allocation9], 4294967280 }
  0x35   :  { %53 = sfence }
  0x36   :  { %v62_v0 = vld [vmem:[#allocation10] sm:$0xff]  ;;  %v63_v1 = vld [vmem:[#allocation10 + $0x8] sm:$0xff]  ;;  %vm70_vm0 = vcmask 1043456   ;;  %v107_v2 = vlaneseq  ;;  %v1047_v3 = vmov 0.0   ;;  %v1048_v10 = vmov 1983009808  }
  0x37   :  { %58 = vst [vmem:[#allocation2] sm:$0xf] %v1047_v3  ;;  %v66_v4 = vcombine.high %v62_v0, %v62_v0  ;;  %v67_v5 = vcombine.high %v63_v1, %v63_v1  ;;  %v71_v6 = vsel %vm70_vm0, %v62_v0, 0.0  ;;  %v85_v7 = vsel %vm70_vm0, %v63_v1, 0.0  ;;  %s1050_s1 = smov 17   ;;  %s1051_s2 = smov 110  }
  0x38   :  { %v72_v8 = vrot.slane %v71_v6, 4  ;;  %v86_v9 = vrot.slane %v85_v7, 4  ;;  %v105_v11 = vunpack.c.l.s4 %v1048_v10  ;;  %v1120_v14 = vshrl.u32 %v107_v2, 7  ;;  %s1052_s15 = smov 126   ;;  %s908_s16 = sld [smem:[#allocation12 + $0xa]] }
  0x39   :  { %v78_v12 = vsel %vm70_vm0, %v66_v4, 0.0  ;;  %v92_v13 = vsel %vm70_vm0, %v67_v5, 0.0  ;;  %v1049_v24 = vmov -inf   ;;  %v134_v26 = vsel %vm70_vm0, %v62_v0, -inf  ;;  %s1053_s17 = smov 112   ;;  %s1054_s18 = smov 96  }
  0x3a   :  { %v73_v15 = vadd.f32 %v72_v8, %v71_v6  ;;  %v79_v16 = vrot.slane %v78_v12, 4  ;;  %v87_v17 = vadd.f32 %v86_v9, %v85_v7  ;;  %v93_v18 = vrot.slane %v92_v13, 4  ;;  %59 = vst [vmem:[#allocation3] sm:$0xf] %v1049_v24  ;;  %s1055_s19 = smov 94   ;;  %s898_s20 = sld [smem:[#allocation12 + $0x1]] }
  0x3b   :  { %v106_v19 = vunpack.c.0.s8 %v105_v11  ;;  %v141_v27 = vsel %vm70_vm0, %v66_v4, -inf  ;;  %v148_v28 = vsel %vm70_vm0, %v63_v1, -inf  ;;  %v135_v33 = vrot.slane %v134_v26, 4  ;;  %s1056_s21 = smov 127   ;;  %s901_s22 = sld [smem:[#allocation12 + $0x4]] }
  0x3c   :  { %v74_v20 = vrot.slane %v73_v15, 2  ;;  %v80_v21 = vadd.f32 %v79_v16, %v78_v12  ;;  %v88_v22 = vrot.slane %v87_v17, 2  ;;  %v94_v23 = vadd.f32 %v93_v18, %v92_v13  ;;  %s904_s23 = sld [smem:[#allocation12 + $0x7]]  ;;  %s1057_s24 = smov 111  }
  0x3d   :  { %v1123_v25 = vsub.s32 %v106_v19, %v1120_v14  ;;  %v142_v34 = vrot.slane %v141_v27, 4  ;;  %v149_v35 = vrot.slane %v148_v28, 4  ;;  %v155_v36 = vsel %vm70_vm0, %v67_v5, -inf  ;;  %s911_s25 = sld [smem:[#allocation12 + $0xd]]  ;;  %s1058_s26 = smov 95  }
  0x3e   :  { %v75_v29 = vadd.f32 %v74_v20, %v73_v15  ;;  %v81_v30 = vrot.slane %v80_v21, 2  ;;  %v89_v31 = vadd.f32 %v88_v22, %v87_v17  ;;  %v95_v32 = vrot.slane %v94_v23, 2  ;;  %v60_v12 = vld [vmem:[#allocation2] sm:$0xf]  ;;  %s914_s27 = sld [smem:[#allocation12 + $0x10]]  ;;  %s899_s29 = sld [smem:[#allocation12 + $0x2]] }
  0x3f   :  { %v136_v41 = vmax.f32 %v134_v26, %v135_v33  ;;  %v143_v42 = vmax.f32 %v141_v27, %v142_v34  ;;  %v150_v43 = vmax.f32 %v148_v28, %v149_v35  ;;  %v156_v44 = vrot.slane %v155_v36, 4  ;;  %s226_s28 = sld [smem:[#allocation12]]  ;;  %s1314_s30 = sld [smem:[#allocation12 + $0x3]] }
  0x40   :  { %v76_v37 = vrot.slane %v75_v29, 1  ;;  %v82_v38 = vadd.f32 %v81_v30, %v80_v21  ;;  %v90_v39 = vrot.slane %v89_v31, 1  ;;  %v96_v40 = vadd.f32 %v95_v32, %v94_v23  ;;  %s1325_s4 = sld [smem:[#allocation12 + $0x5]]  ;;  %s1334_s5 = sld [smem:[#allocation12 + $0x6]] }
  0x41   :  { %v137_v49 = vrot.slane %v136_v41, 2  ;;  %v144_v50 = vrot.slane %v143_v42, 2  ;;  %v151_v51 = vrot.slane %v150_v43, 2  ;;  %v157_v52 = vmax.f32 %v155_v36, %v156_v44  ;;  %v61_v22 = vld [vmem:[#allocation3] sm:$0xf]  ;;  %s1355_s6 = sld [smem:[#allocation12 + $0x8]] }
  0x42   :  { %v77_v45 = vadd.f32 %v76_v37, %v75_v29  ;;  %v83_v46 = vrot.slane %v82_v38, 1  ;;  %v91_v47 = vadd.f32 %v90_v39, %v89_v31  ;;  %v97_v48 = vrot.slane %v96_v40, 1  ;;  %s1360_s0 = sld [smem:[#allocation12 + $0x9]]  ;;  %s1378_s7 = sld [smem:[#allocation12 + $0xb]] }
  0x43   :  { %vm199_vm1 = vcmask 1041408   ;;  %vm200_vm2 = vcmask 1043458   ;;  %v138_v55 = vmax.f32 %v136_v41, %v137_v49  ;;  %v145_v56 = vmax.f32 %v143_v42, %v144_v50  ;;  %s1380_s8 = sld [smem:[#allocation12 + $0xc]]  ;;  %s1388_s9 = sld [smem:[#allocation12 + $0xe]] }
  0x44   :  { %v84_v53 = vadd.f32 %v83_v46, %v82_v38  ;;  %v98_v54 = vadd.f32 %v97_v48, %v96_v40  ;;  %v152_v57 = vmax.f32 %v150_v43, %v151_v51  ;;  %v158_v58 = vrot.slane %v157_v52, 2  ;;  %vm201_vm3 = vmor %vm200_vm2, %vm199_vm1  ;;  %s1400_s10 = sld [smem:[#allocation12 + $0xf]]  ;;  %s1421_s11 = sld [smem:[#allocation12 + $0x11]] }
  0x45   :  { %vm202_vm4 = vcmask 275460   ;;  %v139_v61 = vrot.slane %v138_v55, 1  ;;  %v146_v62 = vrot.slane %v145_v56, 1  ;;  %vm124_vm6 = vcmask 1041409   ;;  %s1060_s12 = smov [#allocation13]  }
  0x46   :  { %v103_v59 = vcombine.low %v77_v45, %v84_v53  ;;  %v111_v60 = vcombine.low %v91_v47, %v98_v54  ;;  %v153_v63 = vrot.slane %v152_v57, 1  ;;  %v159_v0 = vmax.f32 %v157_v52, %v158_v58  ;;  %vm203_vm5 = vmor %vm202_vm4, %vm201_vm3  ;;  %s886_s13 = sshll.u32 %s1060_s12, 4  ;;  %s887_s13 = int_to_ptr.vmem [resolvable:$true] %s886_s13 }
  0x47   :  { %204 = vst.msk [vmem:[#allocation4] sm:$0x3f] %vm203_vm5, %v1047_v3  ;;  %205 = vst.msk [vmem:[#allocation5] sm:$0x3f] %vm203_vm5, %v1047_v3  ;;  %v140_v4 = vmax.f32 %v138_v55, %v139_v61  ;;  %v147_v5 = vmax.f32 %v145_v56, %v146_v62  ;;  %vm126_vm7 = vcmask 1043459   ;;  %vm128_vm8 = vcmask 1045509   ;;  %p1017_p8 = scmp.lt.s32.totalorder %s887_s13, %s887_s13 }
  0x48   :  { %v110_v1 = vrot.slane %v103_v59, %v1123_v25  ;;  %v118_v2 = vrot.slane %v111_v60, %v1123_v25  ;;  %v154_v6 = vmax.f32 %v152_v57, %v153_v63  ;;  %v160_v7 = vrot.slane %v159_v0, 1  ;;  %s1012_s14 = scalar_lea.vmem %s887_s13, 64 }
  0x49   :  { %v166_v10 = vcombine.low %v140_v4, %v147_v5  ;;  %vm130_vm9 = vcmask 1047559   ;;  %vm213_vm10 = vcmask 1041544   ;;  %vm215_vm12 = vcmask 136196   ;;  %p1013_p7 = scmp.ne.s32.totalorder %s887_s13, %s1012_s14  ;;  %p1018_p9 = scmp.lt.s32.totalorder %s1012_s14, %s1012_s14 }
  0x4a   :  { %v123_v8 = vrot.slane %v118_v2, 7  ;;  %v161_v9 = vmax.f32 %v159_v0, %v160_v7  ;;  %vm214_vm11 = vmor %vm200_vm2, %vm213_vm10  ;;  %vm210_vm13 = vcmask 138240   ;;  %v579_v55 = vstv %s908_s16 }
  0x4b   :  { %v173_v3 = vrot.slane %v166_v10, %v1123_v25  ;;  %vm216_vm14 = vmor %vm215_vm12, %vm214_vm11  ;;  %v260_v7 = vstv %s898_s20  ;;  %vm329_vm0 = vcmask 1031168   ;;  %vm437_vm4 = vcmask 900096   ;;  %p1019_p10 = por %p1018_p9, %p1017_p8 }
  0x4c   :  { %v125_v11 = vsel %vm124_vm6, %v123_v8, %v110_v1  ;;  %v174_v15 = vcombine.low %v154_v6, %v161_v9  ;;  %vm366_vm5 = vcmask 916480   ;;  %vm545_vm10 = vcmask 769024  }
  0x4d   :  { %v127_v13 = vsel %vm126_vm7, %v123_v8, %v125_v11  ;;  %vm405_vm11 = vcmask 908288   ;;  %vm513_vm12 = vcmask 777216   ;;  %p1020_p11 = pnand %p1019_p10, %p1013_p7 }
  0x4e   :  { %v129_v16 = vsel %vm128_vm8, %v123_v8, %v127_v13  ;;  %v181_v18 = vrot.slane %v174_v15, %v1123_v25 }
  0x4f   :  { %v131_v17 = vsel %vm130_vm9, %v123_v8, %v129_v16 }
  0x50   :  { %v133_v19 = vadd.f32 %v131_v17, %v60_v12  ;;  %v184_v20 = vrot.slane %v181_v18, 7  ;;  %v380_v12 = vstv %s901_s22 }
  0x52   :  { %191 = vst [vmem:[#allocation2] sm:$0xf] %v133_v19  ;;  %v185_v21 = vsel %vm124_vm6, %v184_v20, %v173_v3 }
  0x53   :  { %v186_v23 = vsel %vm126_vm7, %v184_v20, %v185_v21 }
  0x54   :  { %v187_v24 = vsel %vm128_vm8, %v184_v20, %v186_v23  ;;  %vm285_vm8 = vcmask 1039360  }
  0x55   :  { %v188_v26 = vsel %vm130_vm9, %v184_v20, %v187_v24  ;;  %vm474_vm9 = vcmask 785408  }
  0x56   :  { %v190_v27 = vmax.f32 %v61_v22, %v188_v26 }
  0x58   :  { %192 = vst [vmem:[#allocation3] sm:$0xf] %v190_v27  ;;  %v488_v27 = vstv %s904_s23 }
  0x59   :  { %v196_v28 = vld [vmem:[#allocation2] sm:$0xf] }
  0x5a   :  { %v197_v29 = vmul.f32 0.25, %v196_v28 }
  0x5c   :  { %207 = vrot.lane.b32.xlu0 %v197_v29, %s1050_s1 }
  0x5f   :  { %v198_v30 = vld [vmem:[#allocation3] sm:$0xf] }
  0x60   :  { %219 = vrot.lane.b32.xlu0 %v198_v30, %s1050_s1 }
  0xce   :  { %v208_v31 = vpop.permute.xlu0 %207 }
  0xcf   :  { %v209_v32 = vrot.slane %v208_v31, 6 }
  0xd1   :  { %v211_v33 = vsel %vm210_vm13, %v209_v32, %v208_v31  ;;  %v684_v32 = vstv %s911_s25 }
  0xd2   :  { %217 = vst.msk [vmem:[#allocation4] sm:$0x3f] %vm216_vm14, %v211_v33  ;;  %v220_v34 = vpop.permute.xlu0 %219 }
  0xd3   :  { %v221_v35 = vrot.slane %v220_v34, 6 }
  0xd5   :  { %v222_v36 = vsel %vm210_vm13, %v221_v35, %v220_v34 }
  0xd6   :  { %224 = vst.msk [vmem:[#allocation5] sm:$0x3f] %vm216_vm14, %v222_v36 }
  0xd9   :  { %v293_v41 = vld [vmem:[#allocation4] sm:$0x3f] }
  0xda   :  { %v314_v43 = vrot.slane %v293_v41, %v1123_v25  ;;  %v1149_v45 = vld [vmem:[#allocation4] sm:$0x3f]  ;;  %v307_v1 = vcombine.high %v293_v41, %v293_v41 }
  0xdb   :  { %v342_v46 = vld [vmem:[#allocation4] sm:$0x3f]  ;;  %v422_v47 = vrot.slane %v1149_v45, %v1123_v25  ;;  %v415_v18 = vcombine.high %v1149_v45, %v1149_v45 }
  0xdc   :  { %v351_v48 = vrot.slane %v342_v46, %v1123_v25  ;;  %v1156_v49 = vld [vmem:[#allocation4] sm:$0x3f]  ;;  %v321_v2 = vrot.slane %v307_v1, %v1123_v25  ;;  %v344_v5 = vcombine.high %v342_v46, %v342_v46  ;;  %v322_v9 = vcombine.high %v314_v43, %v314_v43 }
  0xdd   :  { %v716_v37 = vld [vmem:[#allocation5] sm:$0x3f]  ;;  %v1158_v50 = vld [vmem:[#allocation4] sm:$0x3f]  ;;  %v459_v51 = vrot.slane %v1156_v49, %v1123_v25  ;;  %v430_v13 = vcombine.high %v422_v47, %v422_v47  ;;  %v429_v20 = vrot.slane %v415_v18, %v1123_v25  ;;  %v452_v22 = vcombine.high %v1156_v49, %v1156_v49 }
  0xde   :  { %v611_v38 = vld [vmem:[#allocation5] sm:$0x3f]  ;;  %v725_v39 = vrot.slane %v716_v37, %v1123_v25  ;;  %v1166_v52 = vrot.slane %v1158_v50, %v1123_v25  ;;  %v718_v62 = vcombine.high %v716_v37, %v716_v37  ;;  %v259_v6 = vld [vmem:[#allocation4] sm:$0x3f]  ;;  %v358_v8 = vrot.slane %v344_v5, %v1123_v25 }
  0xdf   :  { %v620_v40 = vrot.slane %v611_v38, %v1123_v25  ;;  %v647_v42 = vld [vmem:[#allocation5] sm:$0x3f]  ;;  %v613_v53 = vcombine.high %v611_v38, %v611_v38  ;;  %v261_v10 = vmul.f32 %v260_v7, %v259_v6  ;;  %v379_v11 = vld [vmem:[#allocation4] sm:$0x3f]  ;;  %v359_v3 = vcombine.high %v351_v48, %v351_v48 }
  0xe0   :  { %734 = vrot.lane.b32.xlu1 %v725_v39, %s1051_s2  ;;  %v656_v44 = vrot.slane %v647_v42, %v1123_v25  ;;  %v578_v54 = vld [vmem:[#allocation5] sm:$0x3f]  ;;  %v649_v58 = vcombine.high %v647_v42, %v647_v42  ;;  %v733_v63 = vcombine.high %v725_v39, %v725_v39  ;;  %v732_v4 = vrot.slane %v718_v62, %v1123_v25  ;;  %v487_v26 = vld [vmem:[#allocation4] sm:$0x3f] }
  0xe1   :  { %629 = vrot.lane.b32.xlu0 %v620_v40, %s1052_s15  ;;  %v628_v56 = vcombine.high %v620_v40, %v620_v40  ;;  %v627_v57 = vrot.slane %v613_v53, %v1123_v25  ;;  %v1172_v59 = vmul.f32 %v579_v55, %v578_v54  ;;  %v270_v15 = vrot.slane %v261_v10, %v1123_v25  ;;  %v683_v31 = vld [vmem:[#allocation5] sm:$0x3f] }
  0xe2   :  { %v663_v60 = vrot.slane %v649_v58, %v1123_v25  ;;  %v664_v0 = vcombine.high %v656_v44, %v656_v44  ;;  %v381_v16 = vmul.f32 %v380_v12, %v379_v11  ;;  %v467_v19 = vcombine.high %v459_v51, %v459_v51  ;;  %v752_v46 = vld [vmem:[#allocation5] sm:$0x3f] }
  0xe3   :  { %v589_v61 = vrot.slane %v1172_v59, %v1123_v25  ;;  %v523_v21 = vcombine.high %v1158_v50, %v1158_v50  ;;  %v466_v24 = vrot.slane %v452_v22, %v1123_v25  ;;  %v538_v28 = vcombine.high %v1166_v52, %v1166_v52  ;;  %v821_v53 = vld [vmem:[#allocation5] sm:$0x3f] }
  0xe4   :  { %323 = vrot.lane.b32.xlu1 %v314_v43, %s1052_s15  ;;  %v390_v17 = vrot.slane %v381_v16, %v1123_v25  ;;  %v489_v30 = vmul.f32 %v488_v27, %v487_v26  ;;  %v278_v34 = vcombine.high %v270_v15, %v270_v15  ;;  %v685_v35 = vmul.f32 %v684_v32, %v683_v31  ;;  %v788_v54 = vld [vmem:[#allocation5] sm:$0x3f] }
  0xe5   :  { %665 = vrot.lane.b32.xlu0 %v656_v44, %s1053_s17  ;;  %v537_v23 = vrot.slane %v523_v21, %v1123_v25  ;;  %v597_v29 = vcombine.high %v589_v61, %v589_v61  ;;  %v582_v36 = vcombine.high %v1172_v59, %v1172_v59  ;;  %v383_v39 = vcombine.high %v381_v16, %v381_v16 }
  0xe6   :  { %v498_v33 = vrot.slane %v489_v30, %v1123_v25  ;;  %v694_v37 = vrot.slane %v685_v35, %v1123_v25  ;;  %v263_v40 = vcombine.high %v261_v10, %v261_v10  ;;  %v687_v45 = vcombine.high %v685_v35, %v685_v35 }
  0xe7   :  { %v596_v38 = vrot.slane %v582_v36, %v1123_v25  ;;  %v397_v41 = vrot.slane %v383_v39, %v1123_v25  ;;  %v761_v49 = vrot.slane %v752_v46, %v1123_v25  ;;  %v491_v50 = vcombine.high %v489_v30, %v489_v30 }
  0xe8   :  { %431 = vrot.lane.b32.xlu1 %v422_v47, %s1051_s2  ;;  %v277_v42 = vrot.slane %v263_v40, %v1123_v25  ;;  %v506_v43 = vcombine.high %v498_v33, %v498_v33  ;;  %v702_v44 = vcombine.high %v694_v37, %v694_v37  ;;  %v701_v47 = vrot.slane %v687_v45, %v1123_v25 }
  0xe9   :  { %360 = vrot.lane.b32.xlu0 %v351_v48, %s1053_s17  ;;  %v398_v48 = vcombine.high %v390_v17, %v390_v17  ;;  %v789_v55 = vstv %s914_s27  ;;  %v754_v58 = vcombine.high %v752_v46, %v752_v46  ;;  %v1059_v11 = vmov 0  }
  0xea   :  { %v790_v59 = vmul.f32 %v789_v55, %v788_v54  ;;  %v253_v54 = vstv %s226_s28 }
  0xec   :  { %468 = vrot.lane.b32.xlu1 %v459_v51, %s1054_s18  ;;  %v769_v51 = vcombine.high %v761_v49, %v761_v49  ;;  %v799_v62 = vrot.slane %v790_v59, %v1123_v25  ;;  %v792_v1 = vcombine.high %v790_v59, %v790_v59 }
  0xed   :  { %539 = vrot.lane.b32.xlu0 %v1166_v52, %s1055_s19  ;;  %v505_v52 = vrot.slane %v491_v50, %v1123_v25 }
  0xf0   :  { %631 = vrot.lane.b32.xlu1 %v628_v56, %s1052_s15  ;;  %v830_v56 = vrot.slane %v821_v53, %v1123_v25 }
  0xf1   :  { %633 = vrot.lane.b32.xlu0 %v627_v57, %s1052_s15  ;;  %v823_v57 = vcombine.high %v821_v53, %v821_v53 }
  0xf4   :  { %598 = vrot.lane.b32.xlu1 %v589_v61, %s1056_s21  ;;  %v768_v61 = vrot.slane %v754_v58, %v1123_v25 }
  0xf5   :  { %669 = vrot.lane.b32.xlu0 %v663_v60, %s1053_s17  ;;  %v837_v60 = vrot.slane %v823_v57, %v1123_v25 }
  0xf8   :  { %667 = vrot.lane.b32.xlu1 %v664_v0, %s1053_s17  ;;  %v838_v0 = vcombine.high %v830_v56, %v830_v56 }
  0xf9   :  { %736 = vrot.lane.b32.xlu0 %v733_v63, %s1051_s2  ;;  %v807_v63 = vcombine.high %v799_v62, %v799_v62 }
  0xfc   :  { %738 = vrot.lane.b32.xlu1 %v732_v4, %s1051_s2 }
  0xfd   :  { %327 = vrot.lane.b32.xlu0 %v321_v2, %s1052_s15  ;;  %v806_v2 = vrot.slane %v792_v1, %v1123_v25 }
 0x100   :  { %325 = vrot.lane.b32.xlu1 %v322_v9, %s1052_s15 }
 0x101   :  { %364 = vrot.lane.b32.xlu0 %v358_v8, %s1053_s17  ;;  %v225_v8 = vld [vmem:[#allocation6] sm:$0x3] }
 0x102   :  { %vm294_vm15 = vcmp.lt.s32.totalorder %v225_v8, 15  ;;  %vm228_vm3 = vcmp.ge.s32.totalorder %v225_v8, 1 }
 0x103   :  { %v295_v12 = vsel %vm294_vm15, 1, %v1059_v11 }
 0x104   :  { %279 = vrot.lane.b32.xlu1 %v270_v15, %s1056_s21  ;;  %v236_v15 = vsub.s32 1, %v1120_v14 }
 0x105   :  { %433 = vrot.lane.b32.xlu0 %v430_v13, %s1051_s2  ;;  %v232_v13 = vsub.s32 0, %v1120_v14 }
 0x106   :  { %v1258_v16 = vrot.slane %v295_v12, %v236_v15 }
 0x107   :  { %v1256_v25 = vrot.slane %v295_v12, %v232_v13 }
 0x108   :  { %362 = vrot.lane.b32.xlu1 %v359_v3, %s1053_s17  ;;  %vm305_vm2 = vcmp.eq.s32.totalorder %v1258_v16, 1 }
 0x109   :  { %399 = vrot.lane.b32.xlu0 %v390_v17, %s1057_s24  ;;  %vm304_vm1 = vcmp.eq.s32.totalorder %v1256_v25, 1 }
 0x10c   :  { %435 = vrot.lane.b32.xlu1 %v429_v20, %s1051_s2 }
 0x10d   :  { %470 = vrot.lane.b32.xlu0 %v467_v19, %s1054_s18 }
 0x110   :  { %472 = vrot.lane.b32.xlu1 %v466_v24, %s1054_s18 }
 0x111   :  { %543 = vrot.lane.b32.xlu0 %v537_v23, %s1055_s19  ;;  %v229_v23 = vsel %vm228_vm3, 1, %v1059_v11 }
 0x112   :  { %v1280_v27 = vrot.slane %v229_v23, %v232_v13 }
 0x114   :  { %541 = vrot.lane.b32.xlu1 %v538_v28, %s1055_s19  ;;  %vm238_vm6 = vcmp.eq.s32.totalorder %v1280_v27, 1 }
 0x115   :  { %600 = vrot.lane.b32.xlu0 %v597_v29, %s1056_s21 }
 0x118   :  { %507 = vrot.lane.b32.xlu1 %v498_v33, %s1058_s26 }
 0x119   :  { %281 = vrot.lane.b32.xlu0 %v278_v34, %s1056_s21 }
 0x11c   :  { %602 = vrot.lane.b32.xlu1 %v596_v38, %s1056_s21 }
 0x11d   :  { %703 = vrot.lane.b32.xlu0 %v694_v37, %s1057_s24 }
 0x120   :  { %283 = vrot.lane.b32.xlu1 %v277_v42, %s1056_s21 }
 0x121   :  { %403 = vrot.lane.b32.xlu0 %v397_v41, %s1057_s24 }
 0x124   :  { %705 = vrot.lane.b32.xlu1 %v702_v44, %s1057_s24 }
 0x125   :  { %509 = vrot.lane.b32.xlu0 %v506_v43, %s1058_s26 }
 0x128   :  { %401 = vrot.lane.b32.xlu1 %v398_v48, %s1057_s24  ;;  %v1309_v48 = vrot.slane %v229_v23, %v236_v15 }
 0x129   :  { %707 = vrot.lane.b32.xlu0 %v701_v47, %s1057_s24 }
 0x12a   :  { %vm239_vm7 = vcmp.eq.s32.totalorder %v1309_v48, 1 }
 0x12c   :  { %511 = vrot.lane.b32.xlu1 %v505_v52, %s1058_s26 }
 0x12d   :  { %772 = vrot.lane.b32.xlu0 %v769_v51, %s1054_s18 }
 0x130   :  { %770 = vrot.lane.b32.xlu1 %v761_v49, %s1054_s18  ;;  %v897_v49 = vld.sshfl [vmem:[#allocation4] sm:$0x33 pattern:$0x76325410] }
 0x131   :  { %839 = vrot.lane.b32.xlu0 %v830_v56, %s1055_s19  ;;  %v248_v52 = vcombine.high %v897_v49, %v897_v49  ;;  %v251_v53 = vsel %vm238_vm6, %v897_v49, 0.0 }
 0x134   :  { %774 = vrot.lane.b32.xlu1 %v768_v61, %s1054_s18  ;;  %v254_v61 = vmul.f32 %v253_v54, %v251_v53 }
 0x135   :  { %843 = vrot.lane.b32.xlu0 %v837_v60, %s1055_s19  ;;  %v252_v60 = vsel %vm239_vm7, %v248_v52, 0.0 }
 0x138   :  { %841 = vrot.lane.b32.xlu1 %v838_v0, %s1055_s19 }
 0x139   :  { %810 = vrot.lane.b32.xlu0 %v807_v63, %s1058_s26 }
 0x13c   :  { %808 = vrot.lane.b32.xlu1 %v799_v62, %s1058_s26  ;;  %v336_v62 = vstv %s899_s29 }
 0x140   :  { %812 = vrot.lane.b32.xlu1 %v806_v2, %s1058_s26 }
 0x152   :  { %v735_v4 = vpop.permute.xlu1 %734 }
 0x153   :  { %v630_v5 = vpop.permute.xlu0 %629 }
 0x156   :  { %v1248_v6 = vpop.permute.xlu1 %323 }
 0x157   :  { %v666_v7 = vpop.permute.xlu0 %665 }
 0x15a   :  { %v1250_v9 = vpop.permute.xlu1 %431 }
 0x15b   :  { %v1252_v10 = vpop.permute.xlu0 %360 }
 0x15e   :  { %v1260_v17 = vpop.permute.xlu1 %468 }
 0x15f   :  { %v1262_v3 = vpop.permute.xlu0 %539 }
 0x162   :  { %v632_v18 = vpop.permute.xlu1 %631 }
 0x163   :  { %v634_v19 = vpop.permute.xlu0 %633  ;;  %v635_v20 = vsel %vm329_vm0, %v630_v5, %v632_v18 }
 0x164   :  { %v636_v14 = vsel %vm329_vm0, %v632_v18, %v634_v19  ;;  %v1270_v21 = vsel %vm304_vm1, %v635_v20, 0.0  ;;  %v373_v18 = vstv %s1314_s30 }
 0x165   :  { %v1274_v22 = vsel %vm305_vm2, %v636_v14, 0.0 }
 0x166   :  { %v1278_v26 = vpop.permute.xlu1 %598 }
 0x167   :  { %v1276_v24 = vpop.permute.xlu0 %669 }
 0x16a   :  { %v1284_v29 = vpop.permute.xlu1 %667 }
 0x16b   :  { %v1282_v28 = vpop.permute.xlu0 %736  ;;  %v671_v31 = vsel %vm366_vm5, %v666_v7, %v1284_v29 }
 0x16c   :  { %v740_v30 = vsel %vm437_vm4, %v735_v4, %v1282_v28  ;;  %v1297_v33 = vsel %vm238_vm6, %v671_v31, 0.0 }
 0x16d   :  { %v1293_v32 = vsel %vm304_vm1, %v740_v30, 0.0 }
 0x16e   :  { %v1299_v35 = vpop.permute.xlu1 %738 }
 0x16f   :  { %v328_v34 = vpop.permute.xlu0 %327 }
 0x172   :  { %v326_v37 = vpop.permute.xlu1 %325 }
 0x173   :  { %v365_v36 = vpop.permute.xlu0 %364  ;;  %v330_v55 = vsel %vm329_vm0, %v1248_v6, %v326_v37  ;;  %v331_v56 = vsel %vm329_vm0, %v326_v37, %v328_v34  ;;  %v255_v6 = vmul.f32 %v253_v54, %v252_v60  ;;  %v444_v34 = vstv %s1325_s4 }
 0x174   :  { %v334_v63 = vsel %vm304_vm1, %v330_v55, 0.0  ;;  %v335_v0 = vsel %vm305_vm2, %v331_v56, 0.0  ;;  %v907_v55 = vld.sshfl [vmem:[#allocation5] sm:$0x33 pattern:$0x76325410] }
 0x175   :  { %v337_v11 = vmul.f32 %v336_v62, %v334_v63  ;;  %v338_v12 = vmul.f32 %v336_v62, %v335_v0  ;;  %v567_v0 = vcombine.high %v907_v55, %v907_v55 }
 0x176   :  { %v280_v39 = vpop.permute.xlu1 %279 }
 0x177   :  { %v434_v38 = vpop.permute.xlu0 %433 }
 0x178   :  { %v438_v13 = vsel %vm437_vm4, %v1250_v9, %v434_v38 }
 0x179   :  { %v442_v9 = vsel %vm304_vm1, %v438_v13, 0.0 }
 0x17a   :  { %v363_v41 = vpop.permute.xlu1 %362  ;;  %v445_v49 = vmul.f32 %v444_v34, %v442_v9 }
 0x17b   :  { %v1301_v40 = vpop.permute.xlu0 %399  ;;  %v367_v1 = vsel %vm366_vm5, %v1252_v10, %v363_v41  ;;  %v368_v2 = vsel %vm366_vm5, %v363_v41, %v365_v36 }
 0x17c   :  { %v371_v10 = vsel %vm238_vm6, %v367_v1, 0.0  ;;  %v372_v19 = vsel %vm239_vm7, %v368_v2, 0.0 }
 0x17d   :  { %v374_v37 = vmul.f32 %v373_v18, %v371_v10 }
 0x17e   :  { %v436_v43 = vpop.permute.xlu1 %435 }
 0x17f   :  { %v471_v42 = vpop.permute.xlu0 %470  ;;  %v439_v20 = vsel %vm437_vm4, %v434_v38, %v436_v43  ;;  %v481_v43 = vstv %s1334_s5 }
 0x180   :  { %v475_v36 = vsel %vm474_vm9, %v1260_v17, %v471_v42  ;;  %v443_v41 = vsel %vm305_vm2, %v439_v20, 0.0 }
 0x181   :  { %v446_v56 = vmul.f32 %v444_v34, %v443_v41  ;;  %v672_v34 = vsel %vm366_vm5, %v1284_v29, %v1276_v24 }
 0x182   :  { %v473_v45 = vpop.permute.xlu1 %472  ;;  %v676_v41 = vsel %vm239_vm7, %v672_v34, 0.0 }
 0x183   :  { %v1303_v44 = vpop.permute.xlu0 %543  ;;  %v476_v38 = vsel %vm474_vm9, %v471_v42, %v473_v45 }
 0x186   :  { %v1305_v46 = vpop.permute.xlu1 %541 }
 0x187   :  { %v1307_v47 = vpop.permute.xlu0 %600  ;;  %v546_v60 = vsel %vm545_vm10, %v1262_v3, %v1305_v46 }
 0x188   :  { %v550_v3 = vsel %vm304_vm1, %v546_v60, 0.0  ;;  %v604_v29 = vsel %vm285_vm8, %v1278_v26, %v1307_v47  ;;  %v782_v60 = vstv %s1400_s10 }
 0x18a   :  { %v1311_v50 = vpop.permute.xlu1 %507 }
 0x18b   :  { %v282_v51 = vpop.permute.xlu0 %281 }
 0x18c   :  { %v286_v59 = vsel %vm285_vm8, %v280_v39, %v282_v51  ;;  %v375_v39 = vmul.f32 %v373_v18, %v372_v19  ;;  %v571_v18 = vsel %vm239_vm7, %v567_v0, 0.0 }
 0x18d   :  { %v290_v4 = vadd.f32 %v286_v59, %v254_v61  ;;  %v480_v59 = vsel %vm239_vm7, %v476_v38, 0.0  ;;  %v547_v61 = vsel %vm545_vm10, %v1305_v46, %v1303_v44  ;;  %v741_v38 = vsel %vm437_vm4, %v1282_v28, %v1299_v35 }
 0x18e   :  { %v1323_v58 = vpop.permute.xlu1 %602  ;;  %v483_v1 = vmul.f32 %v481_v43, %v480_v59  ;;  %v551_v44 = vsel %vm305_vm2, %v547_v61, 0.0  ;;  %v746_v28 = vstv %s1388_s9 }
 0x18f   :  { %v1321_v57 = vpop.permute.xlu0 %703  ;;  %v339_v14 = vadd.f32 %v337_v11, %v290_v4  ;;  %v572_v11 = vstv %s1360_s0 }
 0x191   :  { %v376_v17 = vadd.f32 %v374_v37, %v339_v14  ;;  %v641_v37 = vstv %s1378_s7 }
 0x192   :  { %v284_v7 = vpop.permute.xlu1 %283 }
 0x193   :  { %v404_v5 = vpop.permute.xlu0 %403  ;;  %v287_v8 = vsel %vm285_vm8, %v282_v51, %v284_v7  ;;  %v479_v51 = vsel %vm238_vm6, %v475_v36, 0.0  ;;  %v574_v36 = vmul.f32 %v572_v11, %v571_v18 }
 0x194   :  { %v291_v15 = vadd.f32 %v287_v8, %v255_v6  ;;  %v552_v6 = vstv %s1355_s6 }
 0x195   :  { %v553_v10 = vmul.f32 %v552_v6, %v550_v3  ;;  %v554_v19 = vmul.f32 %v552_v6, %v551_v44 }
 0x196   :  { %v340_v23 = vadd.f32 %v338_v12, %v291_v15  ;;  %v1348_v31 = vpop.permute.xlu1 %705  ;;  %v570_v15 = vsel %vm238_vm6, %v907_v55, 0.0 }
 0x197   :  { %v510_v30 = vpop.permute.xlu0 %509  ;;  %v709_v0 = vsel %vm405_vm11, %v1321_v57, %v1348_v31 }
 0x198   :  { %v377_v53 = vadd.f32 %v375_v39, %v340_v23  ;;  %v514_v12 = vsel %vm513_vm12, %v1311_v50, %v510_v30  ;;  %v677_v39 = vstv %s1380_s8 }
 0x199   :  { %v678_v35 = vmul.f32 %v677_v39, %v1297_v33  ;;  %v679_v59 = vmul.f32 %v677_v39, %v676_v41 }
 0x19a   :  { %v402_v54 = vpop.permute.xlu1 %401 }
 0x19b   :  { %v1365_v52 = vpop.permute.xlu0 %707  ;;  %v406_v42 = vsel %vm405_vm11, %v1301_v40, %v402_v54  ;;  %v407_v45 = vsel %vm405_vm11, %v402_v54, %v404_v5  ;;  %v482_v40 = vmul.f32 %v481_v43, %v479_v51  ;;  %v643_v54 = vmul.f32 %v641_v37, %v1274_v22 }
 0x19c   :  { %v410_v62 = vadd.f32 %v406_v42, %v376_v17  ;;  %v411_v63 = vadd.f32 %v407_v45, %v377_v53  ;;  %v605_v17 = vsel %vm285_vm8, %v1307_v47, %v1323_v58  ;;  %v642_v53 = vmul.f32 %v641_v37, %v1270_v21 }
 0x19d   :  { %v745_v42 = vsel %vm305_vm2, %v741_v38, 0.0  ;;  %v747_v22 = vmul.f32 %v746_v28, %v1293_v32 }
 0x19e   :  { %v447_v2 = vadd.f32 %v445_v49, %v410_v62  ;;  %v448_v4 = vadd.f32 %v446_v56, %v411_v63  ;;  %v512_v5 = vpop.permute.xlu1 %511  ;;  %v748_v61 = vmul.f32 %v746_v28, %v745_v42 }
 0x19f   :  { %v773_v7 = vpop.permute.xlu0 %772  ;;  %v515_v13 = vsel %vm513_vm12, %v510_v30, %v512_v5  ;;  %v573_v30 = vmul.f32 %v572_v11, %v570_v15 }
 0x1a0   :  { %v484_v46 = vadd.f32 %v482_v40, %v447_v2  ;;  %v485_v8 = vadd.f32 %v483_v1, %v448_v4  ;;  %v710_v40 = vsel %vm405_vm11, %v1348_v31, %v1365_v52 }
 0x1a2   :  { %v518_v20 = vadd.f32 %v514_v12, %v484_v46  ;;  %v519_v14 = vadd.f32 %v515_v13, %v485_v8  ;;  %v771_v23 = vpop.permute.xlu1 %770  ;;  %v851_v8 = vstv %s1421_s11 }
 0x1a3   :  { %v840_v51 = vpop.permute.xlu0 %839  ;;  %v776_v45 = vsel %vm474_vm9, %v771_v23, %v773_v7 }
 0x1a4   :  { %v555_v50 = vadd.f32 %v553_v10, %v518_v20  ;;  %v556_v9 = vadd.f32 %v554_v19, %v519_v14  ;;  %v780_v1 = vsel %vm238_vm6, %v776_v45, 0.0 }
 0x1a5   :  { %v783_v44 = vmul.f32 %v782_v60, %v780_v1 }
 0x1a6   :  { %v575_v43 = vadd.f32 %v573_v30, %v555_v50  ;;  %v576_v49 = vadd.f32 %v574_v36, %v556_v9  ;;  %v775_v24 = vpop.permute.xlu1 %774 }
 0x1a7   :  { %v777_v47 = vsel %vm474_vm9, %v773_v7, %v775_v24  ;;  %v844_v62 = vpop.permute.xlu0 %843 }
 0x1a8   :  { %v609_v55 = vadd.f32 %v605_v17, %v576_v49  ;;  %v608_v56 = vadd.f32 %v604_v29, %v575_v43  ;;  %v781_v2 = vsel %vm239_vm7, %v777_v47, 0.0 }
 0x1a9   :  { %v784_v46 = vmul.f32 %v782_v60, %v781_v2 }
 0x1aa   :  { %v645_v26 = vadd.f32 %v643_v54, %v609_v55  ;;  %v842_v58 = vpop.permute.xlu1 %841  ;;  %v644_v21 = vadd.f32 %v642_v53, %v608_v56 }
 0x1ab   :  { %v845_v32 = vsel %vm545_vm10, %v840_v51, %v842_v58  ;;  %v846_v4 = vsel %vm545_vm10, %v842_v58, %v844_v62  ;;  %v811_v48 = vpop.permute.xlu0 %810 }
 0x1ac   :  { %v680_v33 = vadd.f32 %v678_v35, %v644_v21  ;;  %v681_v63 = vadd.f32 %v679_v59, %v645_v26  ;;  %v849_v31 = vsel %vm304_vm1, %v845_v32, 0.0  ;;  %v850_v27 = vsel %vm305_vm2, %v846_v4, 0.0 }
 0x1ad   :  { %v852_v18 = vmul.f32 %v851_v8, %v849_v31  ;;  %v853_v10 = vmul.f32 %v851_v8, %v850_v27 }
 0x1ae   :  { %v809_v5 = vpop.permute.xlu1 %808  ;;  %v713_v6 = vadd.f32 %v709_v0, %v680_v33  ;;  %v714_v3 = vadd.f32 %v710_v40, %v681_v63 }
 0x1af   :  { %v814_v13 = vsel %vm513_vm12, %v809_v5, %v811_v48 }
 0x1b0   :  { %v749_v57 = vadd.f32 %v747_v22, %v713_v6  ;;  %v750_v7 = vadd.f32 %v748_v61, %v714_v3 }
 0x1b2   :  { %v785_v52 = vadd.f32 %v783_v44, %v749_v57  ;;  %v813_v11 = vpop.permute.xlu1 %812  ;;  %v786_v12 = vadd.f32 %v784_v46, %v750_v7 }
 0x1b3   :  { %v815_v15 = vsel %vm513_vm12, %v811_v48, %v813_v11 }
 0x1b4   :  { %v818_v19 = vadd.f32 %v814_v13, %v785_v52  ;;  %v819_v20 = vadd.f32 %v815_v15, %v786_v12 }
 0x1b6   :  { %v854_v14 = vadd.f32 %v852_v18, %v818_v19  ;;  %v855_v23 = vadd.f32 %v853_v10, %v819_v20 }
 0x1b8   :  { %v856_v34 = vsub.f32 0.0, %v854_v14  ;;  %v857_v25 = vsub.f32 0.0, %v855_v23 }
 0x1ba   :  { %v858_v50 = vmul.f32 1.442695, %v856_v34  ;;  %v860_v9 = vmul.f32 1.442695, %v857_v25 }
 0x1bc   :  { %948 = vpow2.f32 %v858_v50 }
 0x1bd   :  { %950 = vpow2.f32 %v860_v9 }
 0x1c6   :  { %v949_v16 = vpop.eup %948 }
 0x1c7   :  { %v951_v30 = vpop.eup %950  ;;  %v862_v36 = vadd.f32 1.0, %v949_v16 }
 0x1c8   :  { %v863_v37 = vadd.f32 1.0, %v951_v30 }
 0x1c9   :  { %952 = vrcp.f32 %v862_v36 }
 0x1ca   :  { %954 = vrcp.f32 %v863_v37 }
 0x1d3   :  { %v953_v39 = vpop.eup %952 }
 0x1d4   :  { %v955_v41 = vpop.eup %954 }
 0x1d5   :  { %v870_v38 = vcombine.low %v953_v39, %v955_v41 }
 0x1d7   :  { %916 = vst.sshfl [vmem:[#allocation13] sm:$0x33 pattern:$0x76325410] %v870_v38 }
 0x1d8   :  { %1023 = shalt.err (!%p1020_p11)
}
 0x1d9   :  { %s1024_s15 = scalar_lea.hbm %s1461_s3, 64 }
 0x1da   :  { %p1025_p12 = scmp.ne.s32.totalorder %s1461_s3, %s1024_s15  ;;  %p1028_p13 = scmp.lt.u32.totalorder %s1024_s15, %s1461_s3 }
 0x1dc   :  { %p1030_p0 = pnand %p1028_p13, %p1025_p12 }
 0x1de   :  { %1033 = shalt.err (!%p1030_p0)
}
 0x1df   :  { %889 = dma.vmem_to_hbm [thread:$0]  %s887_s13, 64, %s1461_s3, [#allocation8]  }
 0x1e0   :  { %1040 = dma.done.wait [#allocation8], 64  }
 0x1e1   :  { %1041 = vsyncadd [#allocation8], 4294967232 }
 0x1e2   :  { %893 = vsyncpa [#allocation7], 1 }
 0x1e3   :  { %894 = vsyncpa [#allocation11], 1 }
 0x1e4   :  { %895 = vsyncpa [#allocation8], 1 }
 0x1e5   :  { %896 = vsyncpa [#allocation9], 1 }

</bundles_post_ra>
